<compile_context>
chip_gen: v7x
topology: tpu7x:2x2x1
jax: 0.10.0
libtpu: 0.0.40
codegen_flags: <defaults>
</compile_context>

<pallas_src>
import functools

import jax
import jax.numpy as jnp
from jax import lax
from jax.experimental import pallas as pl
from jax.experimental.pallas import tpu as pltpu

_LANE = 128
_SUBLANE = 8

_TILE_ROWS = 4096                 # 2 MiB per f32 operand block in the two-pass path
_TWO_PASS_VMEM_LIMIT = 32 << 20   # explicit scoped-VMEM limit: > v5e's 16 MiB default,
                                  # < v7x's 64 MiB physical
_FUSED_BYTES_PER_ROW = 3584       # conservative: x + t + out (f32) + ~4 full-size f32 temps
_FUSED_VMEM_FRACTION = 0.55       # fraction of detected VMEM usable by the fused path


def _vmem_capacity_bytes():
    """Best-effort per-core VMEM capacity; conservative 64 MiB (v7x) fallback."""
    try:
        info = pltpu.get_tpu_info()
        cap = getattr(info, "vmem_capacity_bytes", None)
        if cap:
            return int(cap)
    except Exception:
        pass
    return 64 << 20


def _f32(v):
    return v if v.dtype == jnp.float32 else v.astype(jnp.float32)


def _bce_and_sigmoid(x, t):
    """Numerically stable BCEWithLogits and sigmoid sharing a single EUP exp.

    BCE      = max(x, 0) - x*t + log1p(exp(-|x|))
    sigmoid  = 1/(1+e) for x >= 0, else 1 - 1/(1+e), with e = exp(-|x|).
    The reciprocal uses the approximate EUP vrcp plus one VPU Newton step.
    """
    e = jnp.exp(-jnp.abs(x))
    bce = jnp.maximum(x, 0.0) - x * t + jnp.log1p(e)
    denom = 1.0 + e
    r = pl.reciprocal(denom, approx=True)
    r = r * (2.0 - denom * r)          # one Newton refinement -> ~full f32 precision
    sig = jnp.where(x >= 0.0, r, 1.0 - r)
    return bce, sig


def _abs_pow(d, gamma):
    """|d| ** gamma. Integer gamma in [0, 4] uses VALU multiplies instead of EUP exp/log."""
    g = float(gamma)
    if g == float(int(g)) and 0 <= int(g) <= 4:
        gi = int(g)
        if gi == 0:
            return jnp.ones_like(d)        # matches torch.pow(0., 0.) == 1
        if gi % 2 == 0:
            base = d * d                   # even power: no abs needed
            out = base
            for _ in range(gi // 2 - 1):
                out = out * base
            return out
        a = jnp.abs(d)
        out = a
        for _ in range(gi - 1):
            out = out * a
        return out
    return jnp.power(jnp.abs(d), gamma)


def _valid_mask(shape2, row_offset, n_valid):
    """Boolean mask of flat-index < n_valid for a (rows, 128) tile starting at row_offset."""
    r = lax.broadcasted_iota(jnp.int32, shape2, 0)
    c = lax.broadcasted_iota(jnp.int32, shape2, 1)
    flat = (row_offset + r) * _LANE + c    # int32: fine for < 2^31 total elements
    return flat < n_valid


# ---------------------------------------------------------------------------
# Fused single-call path (whole problem resident in VMEM).
# ---------------------------------------------------------------------------
def _fused_kernel(x_ref, t_ref, out_ref, *, gamma, alpha, inv_n, n_valid, needs_mask):
    x = _f32(x_ref[...])
    t = _f32(t_ref[...])
    bce, sig = _bce_and_sigmoid(x, t)
    if needs_mask:
        bce = jnp.where(_valid_mask(x.shape, 0, n_valid), bce, 0.0)
    mean = jnp.sum(bce) * inv_n
    w = alpha * _abs_pow(t - sig, gamma)
    out_ref[...] = (mean * w).astype(out_ref.dtype)


def _focal_fused(x2, t2, out_dtype, gamma, alpha, n_valid, vmem_cap):
    rows, lane = x2.shape
    needs_mask = n_valid != rows * lane
    needed = rows * _FUSED_BYTES_PER_ROW + (4 << 20)
    vmem_limit = int(min(max(needed, 16 << 20), vmem_cap))
    return pl.pallas_call(
        functools.partial(_fused_kernel, gamma=gamma, alpha=alpha,
                          inv_n=1.0 / n_valid, n_valid=n_valid, needs_mask=needs_mask),
        out_shape=jax.ShapeDtypeStruct((rows, lane), out_dtype),
        compiler_params=pltpu.CompilerParams(vmem_limit_bytes=vmem_limit),
    )(x2, t2)


# ---------------------------------------------------------------------------
# Two-pass path for inputs too large to keep fully resident in VMEM.
# ---------------------------------------------------------------------------
def _pass1_kernel(x_ref, t_ref, w_ref, psum_ref, *, gamma, alpha, tile_rows,
                  n_valid, needs_mask):
    x = _f32(x_ref[...])
    t = _f32(t_ref[...])
    bce, sig = _bce_and_sigmoid(x, t)
    if needs_mask:
        row0 = pl.program_id(0) * tile_rows
        bce = jnp.where(_valid_mask(x.shape, row0, n_valid), bce, 0.0)
    # Per-tile (8,128) vreg-shaped partial sum: pure VPU adds, no carried state, so the
    # grid axis is fully parallel (shards across v7x's two TensorCores).
    psum_ref[...] = jnp.sum(
        bce.reshape(tile_rows // _SUBLANE, _SUBLANE, _LANE), axis=0, keepdims=True)
    # Focal weight in the OUTPUT dtype (halves w traffic for sub-32-bit inputs).
    w_ref[...] = (alpha * _abs_pow(t - sig, gamma)).astype(w_ref.dtype)


def _pass2_kernel(mean_ref, w_ref, out_ref):
    out_ref[...] = (mean_ref[0, 0] * w_ref[...]).astype(out_ref.dtype)


def _focal_two_pass(x2, t2, out_dtype, gamma, alpha, n_valid):
    rows, lane = x2.shape
    tile_rows = _TILE_ROWS
    n_tiles = (rows + tile_rows - 1) // tile_rows
    needs_mask = (n_valid != rows * lane) or (rows % tile_rows != 0)

    w, psum = pl.pallas_call(
        functools.partial(_pass1_kernel, gamma=gamma, alpha=alpha, tile_rows=tile_rows,
                          n_valid=n_valid, needs_mask=needs_mask),
        out_shape=(
            jax.ShapeDtypeStruct((rows, lane), out_dtype),                   # focal weight w
            jax.ShapeDtypeStruct((n_tiles, _SUBLANE, _LANE), jnp.float32),   # per-tile BCE partials
        ),
        grid=(n_tiles,),
        in_specs=[
            pl.BlockSpec((tile_rows, lane), lambda i: (i, 0)),
            pl.BlockSpec((tile_rows, lane), lambda i: (i, 0)),
        ],
        out_specs=(
            pl.BlockSpec((tile_rows, lane), lambda i: (i, 0)),
            pl.BlockSpec((1, _SUBLANE, _LANE), lambda i: (i, 0, 0)),
        ),
        compiler_params=pltpu.CompilerParams(
            dimension_semantics=("parallel",),
            vmem_limit_bytes=_TWO_PASS_VMEM_LIMIT),
    )(x2, t2)

    # Trivial XLA reduce over n_tiles * 1024 floats; fold 1/N here.
    mean = (jnp.sum(psum) * (1.0 / n_valid)).astype(jnp.float32).reshape(1, 1)

    out2 = pl.pallas_call(
        _pass2_kernel,
        out_shape=jax.ShapeDtypeStruct((rows, lane), out_dtype),
        grid=(n_tiles,),
        in_specs=[
            pl.BlockSpec(memory_space=pltpu.MemorySpace.SMEM),   # invariant scalar in SMEM
            pl.BlockSpec((tile_rows, lane), lambda i: (i, 0)),
        ],
        out_specs=pl.BlockSpec((tile_rows, lane), lambda i: (i, 0)),
        input_output_aliases={1: 0},   # write the result in place over w
        compiler_params=pltpu.CompilerParams(
            dimension_semantics=("parallel",),
            vmem_limit_bytes=_TWO_PASS_VMEM_LIMIT),
    )(mean, w)
    return out2


# ---------------------------------------------------------------------------
# Public wrapper.
# ---------------------------------------------------------------------------
def focal_loss(x, target, *, gamma=2.0, alpha=1.0, fused_max_rows=None):
    assert x.shape == target.shape
    orig_shape = x.shape
    out_dtype = x.dtype
    n = x.size
    rows = (n + _LANE - 1) // _LANE
    padded = rows * _LANE

    xf = x.reshape(-1)
    tf = target.reshape(-1)
    if padded != n:
        xf = jnp.pad(xf, (0, padded - n))
        tf = jnp.pad(tf, (0, padded - n))
    x2 = xf.reshape(rows, _LANE)
    t2 = tf.reshape(rows, _LANE)

    vmem_cap = _vmem_capacity_bytes()
    if fused_max_rows is None:
        fused_max_rows = max(_SUBLANE,
                             int(vmem_cap * _FUSED_VMEM_FRACTION) // _FUSED_BYTES_PER_ROW)

    if rows <= fused_max_rows:
        out2 = _focal_fused(x2, t2, out_dtype, gamma, alpha, n, vmem_cap)
    else:
        out2 = _focal_two_pass(x2, t2, out_dtype, gamma, alpha, n)

    out_flat = out2.reshape(-1)
    if padded != n:
        out_flat = out_flat[:n]
    return out_flat.reshape(orig_shape)


def _reference(x, target, gamma=2.0, alpha=1.0):
    xf = x.astype(jnp.float32)
    tf = target.astype(jnp.float32)
    bce = jnp.maximum(xf, 0.0) - xf * tf + jnp.log1p(jnp.exp(-jnp.abs(xf)))
    loss = jnp.mean(bce)
    out = loss * alpha * jnp.power(jnp.abs(tf - jax.nn.sigmoid(xf)), gamma)
    return out.astype(x.dtype)


if __name__ == "__main__":
    key = jax.random.PRNGKey(0)
    k1, k2, k3, k4, k5, k6 = jax.random.split(key, 6)

    # 1) NCHW inputs matching the module's typical use (fused single-call path).
    x = jax.random.normal(k1, (2, 4, 16, 16), dtype=jnp.float32)
    target = jax.random.uniform(k2, (2, 4, 16, 16), dtype=jnp.float32)
    out = jax.block_until_ready(focal_loss(x, target, gamma=2.0, alpha=1.0))
    ref = _reference(x, target, 2.0, 1.0)
    assert out.shape == x.shape
    assert jnp.allclose(out, ref, atol=1e-5, rtol=1e-5), "fused path mismatch vs reference"

    # 2) Shape not divisible by 128: exercises flat pad + in-kernel validity mask (fused).
    xo = jax.random.normal(k3, (3, 5, 7, 11), dtype=jnp.float32)
    to = jax.random.uniform(k4, (3, 5, 7, 11), dtype=jnp.float32)
    outo = jax.block_until_ready(focal_loss(xo, to, gamma=2.0, alpha=1.0))
    refo = _reference(xo, to, 2.0, 1.0)
    assert outo.shape == xo.shape
    assert jnp.allclose(outo, refo, atol=1e-5, rtol=1e-5), "masked fused path mismatch"

    # 3) Two-pass path forced via fused_max_rows=0: 8300 rows -> 3 grid steps of 4096 with a
    #    masked partial last tile, parallel per-tile partial sums, aliased pass-2 output.
    xl = jax.random.normal(k5, (8300, 128), dtype=jnp.float32)
    tl = jax.random.uniform(k6, (8300, 128), dtype=jnp.float32)
    outl = jax.block_until_ready(focal_loss(xl, tl, gamma=2.0, alpha=1.0, fused_max_rows=0))
    refl = _reference(xl, tl, 2.0, 1.0)
    assert outl.shape == xl.shape
    # Looser rtol: blocked/tiled f32 accumulation order differs from XLA's reference reduce.
    assert jnp.allclose(outl, refl, atol=1e-5, rtol=2e-4), "two-pass path mismatch vs reference"

    print("KERNEL_OK")
</pallas_src>

<mosaic_0001>
module attributes {stable_mosaic.version = 11 : i64} {
  func.func @_fused_kernel(%arg0: memref<16x128xf32, #tpu.memory_space<vmem>>, %arg1: memref<16x128xf32, #tpu.memory_space<vmem>>, %arg2: memref<16x128xf32, #tpu.memory_space<vmem>>) attributes {dimension_semantics = [], scalar_prefetch = 0 : i64, scratch_operands = 0 : i64, tpu.core_type = #tpu.core_type<tc>} {
    %c0 = arith.constant 0 : index
    %c0_0 = arith.constant 0 : index
    %0 = vector.load %arg0[%c0, %c0_0] : memref<16x128xf32, #tpu.memory_space<vmem>>, vector<16x128xf32>
    %c0_1 = arith.constant 0 : index
    %c0_2 = arith.constant 0 : index
    %1 = vector.load %arg1[%c0_1, %c0_2] : memref<16x128xf32, #tpu.memory_space<vmem>>, vector<16x128xf32>
    %2 = math.absf %0 : vector<16x128xf32>
    %cst = arith.constant 0.000000e+00 : f32
    %3 = vector.broadcast %cst : f32 to vector<16x128xf32>
    %4 = arith.subf %3, %2 : vector<16x128xf32>
    %5 = math.exp %4 : vector<16x128xf32>
    %cst_3 = arith.constant 0.000000e+00 : f32
    %6 = vector.broadcast %cst_3 : f32 to vector<16x128xf32>
    %7 = arith.maximumf %0, %6 : vector<16x128xf32>
    %8 = arith.mulf %0, %1 : vector<16x128xf32>
    %9 = arith.subf %7, %8 : vector<16x128xf32>
    %10 = math.log1p %5 : vector<16x128xf32>
    %11 = arith.addf %9, %10 : vector<16x128xf32>
    %cst_4 = arith.constant 1.000000e+00 : f32
    %12 = vector.broadcast %cst_4 : f32 to vector<16x128xf32>
    %13 = arith.addf %12, %5 : vector<16x128xf32>
    %14 = tpu.reciprocal %13 {approx = true} : vector<16x128xf32> -> vector<16x128xf32>
    %15 = arith.mulf %13, %14 : vector<16x128xf32>
    %cst_5 = arith.constant 2.000000e+00 : f32
    %16 = vector.broadcast %cst_5 : f32 to vector<16x128xf32>
    %17 = arith.subf %16, %15 : vector<16x128xf32>
    %18 = arith.mulf %14, %17 : vector<16x128xf32>
    %cst_6 = arith.constant 0.000000e+00 : f32
    %19 = vector.broadcast %cst_6 : f32 to vector<16x128xf32>
    %20 = arith.cmpf oge, %0, %19 : vector<16x128xf32>
    %cst_7 = arith.constant 1.000000e+00 : f32
    %21 = vector.broadcast %cst_7 : f32 to vector<16x128xf32>
    %22 = arith.subf %21, %18 : vector<16x128xf32>
    %23 = arith.select %20, %18, %22 : vector<16x128xi1>, vector<16x128xf32>
    %24 = vector.shape_cast %11 : vector<16x128xf32> to vector<1x16x128xf32>
    %cst_8 = arith.constant dense<0.000000e+00> : vector<1xf32>
    %25 = vector.multi_reduction <add>, %24, %cst_8 [1, 2] : vector<1x16x128xf32> to vector<1xf32>
    %26 = vector.shape_cast %25 : vector<1xf32> to vector<1x1x1xf32>
    %27 = vector.extract %26[0, 0, 0] : f32 from vector<1x1x1xf32>
    %cst_9 = arith.constant 4.8828125E-4 : f32
    %28 = arith.mulf %27, %cst_9 : f32
    %29 = arith.subf %1, %23 : vector<16x128xf32>
    %30 = arith.mulf %29, %29 : vector<16x128xf32>
    %cst_10 = arith.constant 1.000000e+00 : f32
    %31 = vector.broadcast %cst_10 : f32 to vector<16x128xf32>
    %32 = arith.mulf %31, %30 : vector<16x128xf32>
    %33 = vector.broadcast %28 : f32 to vector<16x128xf32>
    %34 = arith.mulf %33, %32 : vector<16x128xf32>
    %c0_11 = arith.constant 0 : index
    %c0_12 = arith.constant 0 : index
    %35 = vector.load %arg2[%c0_11, %c0_12] : memref<16x128xf32, #tpu.memory_space<vmem>>, vector<16x128xf32>
    tpu.vector_store %arg2[%c0_11, %c0_12], %34 {strides = array<i32>} : memref<16x128xf32, #tpu.memory_space<vmem>>, vector<16x128xf32>,
    return
  }
}

</mosaic_0001>

<bundles_post_ra>
// kernel: tpu_custom_call.1
= control target key start
LH: loop header
LB: loop body
LE: loop exit
PB: predicated region body
PF: predicated region fallthrough
CT: control target
= control target key end

     0   :  { %7 = vsyncpa [#allocation3], 0  ;;  %s288_s0 = inlined_call_operand.hbm [shape: f32[16,128], index: 0, kind: input, shape index: {}]   ;;  %s289_s1 = inlined_call_operand.hbm [shape: f32[16,128], index: 1, kind: input, shape index: {}]   ;;  %s290_s2 = inlined_call_operand.hbm [shape: f32[16,128], index: 2, kind: output, shape index: {}]  }
   0x1   :  { %8 = vsyncpa [#allocation6], 0 }
   0x2   :  { %9 = vsyncpa [#allocation4], 0  ;;  %s223_s9 = smov [#allocation2]   ;;  %s151_s13 = scalar_lea.hbm %s288_s0, 256 }
   0x3   :  { %s15_s10 = sshll.u32 %s223_s9, 4  ;;  %p152_p0 = scmp.ne.s32.totalorder %s288_s0, %s151_s13  ;;  %s16_s10 = int_to_ptr.vmem [resolvable:$true] %s15_s10 }
   0x4   :  { %p155_p1 = scmp.lt.u32.totalorder %s151_s13, %s288_s0 }
   0x6   :  { %p157_p2 = pnand %p155_p1, %p152_p0 }
   0x8   :  { %160 = shalt.err (!%p157_p2)
}
   0x9   :  { %s161_s18 = scalar_lea.vmem %s16_s10, 256  ;;  %p166_p4 = scmp.lt.s32.totalorder %s16_s10, %s16_s10 }
   0xa   :  { %p162_p3 = scmp.ne.s32.totalorder %s16_s10, %s161_s18  ;;  %p167_p5 = scmp.lt.s32.totalorder %s161_s18, %s161_s18 }
   0xc   :  { %p168_p6 = por %p167_p5, %p166_p4 }
   0xe   :  { %p169_p7 = pnand %p168_p6, %p162_p3 }
  0x10   :  { %172 = shalt.err (!%p169_p7)
}
  0x11   :  { %s224_s19 = smov 128   ;;  %s225_s20 = smov 8  }
  0x12   :  { %21 = dma.hbm_to_vmem [thread:$0]  %s288_s0, 256, %s16_s10, [#allocation3], %s224_s19, %s224_s19, %s225_s20  }
  0x13   :  { %s226_s23 = smov [#allocation5]   ;;  %s173_s27 = scalar_lea.hbm %s289_s1, 256 }
  0x14   :  { %s27_s24 = sshll.u32 %s226_s23, 4  ;;  %p174_p8 = scmp.ne.s32.totalorder %s289_s1, %s173_s27  ;;  %s28_s24 = int_to_ptr.vmem [resolvable:$true] %s27_s24 }
  0x15   :  { %p177_p9 = scmp.lt.u32.totalorder %s173_s27, %s289_s1 }
  0x17   :  { %p179_p10 = pnand %p177_p9, %p174_p8 }
  0x19   :  { %182 = shalt.err (!%p179_p10)
}
  0x1a   :  { %s183_s4 = scalar_lea.vmem %s28_s24, 256  ;;  %p188_p12 = scmp.lt.s32.totalorder %s28_s24, %s28_s24 }
  0x1b   :  { %p184_p11 = scmp.ne.s32.totalorder %s28_s24, %s183_s4  ;;  %p189_p13 = scmp.lt.s32.totalorder %s183_s4, %s183_s4 }
  0x1d   :  { %p190_p0 = por %p189_p13, %p188_p12 }
  0x1f   :  { %p191_p1 = pnand %p190_p0, %p184_p11 }
  0x21   :  { %194 = shalt.err (!%p191_p1)
}
  0x22   :  { %33 = dma.hbm_to_vmem [thread:$0]  %s289_s1, 256, %s28_s24, [#allocation6], %s224_s19, %s224_s19, %s225_s20  }
  0x23   :  { %217 = dma.done.wait [#allocation3], 256  }
  0x24   :  { %218 = vsyncadd [#allocation3], 4294967040 }
  0x25   :  { %219 = dma.done.wait [#allocation6], 256  }
  0x26   :  { %220 = vsyncadd [#allocation6], 4294967040  ;;  %v40_v0 = vld [vmem:[#allocation2] sm:$0xff]  ;;  %v41_v1 = vld [vmem:[#allocation2 + $0x8] sm:$0xff]  ;;  %s227_s7 = smov [#allocation7]  }
  0x27   :  { %v44_v2 = vand.u32 2147483647, %v40_v0  ;;  %v45_v3 = vand.u32 2147483647, %v41_v1  ;;  %v42_v14 = vld [vmem:[#allocation5] sm:$0xff]  ;;  %v43_v15 = vld [vmem:[#allocation5 + $0x8] sm:$0xff] }
  0x28   :  { %v52_v17 = vmax.f32 %v40_v0, 0.0  ;;  %v54_v18 = vmul.f32 %v42_v14, %v40_v0  ;;  %v53_v21 = vmax.f32 %v41_v1, 0.0  ;;  %v55_v22 = vmul.f32 %v43_v15, %v41_v1  ;;  %s119_s8 = sshll.u32 %s227_s7, 4  ;;  %s120_s8 = int_to_ptr.vmem [resolvable:$true] %s119_s8 }
  0x29   :  { %v46_v4 = vsub.f32 0.0, %v44_v2  ;;  %v47_v5 = vsub.f32 0.0, %v45_v3  ;;  %vm88_vm2 = vcmp.ge.f32.partialorder %v40_v0, 0.0  ;;  %vm89_vm3 = vcmp.ge.f32.partialorder %v41_v1, 0.0  ;;  %s195_s9 = scalar_lea.vmem %s120_s8, 256  ;;  %p200_p3 = scmp.lt.s32.totalorder %s120_s8, %s120_s8 }
  0x2a   :  { %v56_v26 = vsub.f32 %v52_v17, %v54_v18  ;;  %v57_v29 = vsub.f32 %v53_v21, %v55_v22  ;;  %p196_p2 = scmp.ne.s32.totalorder %s120_s8, %s195_s9  ;;  %p201_p4 = scmp.lt.s32.totalorder %s195_s9, %s195_s9 }
  0x2b   :  { %v48_v6 = vmul.f32 1.442695, %v46_v4  ;;  %v50_v7 = vmul.f32 1.442695, %v47_v5 }
  0x2c   :  { %p202_p5 = por %p201_p4, %p200_p3 }
  0x2d   :  { %139 = vpow2.f32 %v48_v6 }
  0x2e   :  { %141 = vpow2.f32 %v50_v7  ;;  %p203_p6 = pnand %p202_p5, %p196_p2 }
  0x37   :  { %v140_v8 = vpop.eup %139 }
  0x38   :  { %v142_v9 = vpop.eup %141  ;;  %v58_v10 = vadd.f32 1.0, %v140_v8  ;;  %v61_v12 = vmul.f32 -0.5, %v140_v8  ;;  %v64_v19 = vand.u32 2147483647, %v140_v8 }
  0x39   :  { %v67_v11 = vadd.f32 1.0, %v142_v9  ;;  %v70_v13 = vmul.f32 -0.5, %v142_v9  ;;  %v73_v23 = vand.u32 2147483647, %v142_v9 }
  0x3a   :  { %143 = vlog2.f32 %v58_v10  ;;  %v62_v16 = vadd.f32 1.0, %v61_v12  ;;  %vm65_vm0 = vcmp.lt.f32.partialorder %v64_v19, 0.0004427343 }
  0x3b   :  { %145 = vlog2.f32 %v67_v11  ;;  %v71_v20 = vadd.f32 1.0, %v70_v13  ;;  %vm74_vm1 = vcmp.lt.f32.partialorder %v73_v23, 0.0004427343 }
  0x3c   :  { %v63_v24 = vmul.f32 %v140_v8, %v62_v16  ;;  %147 = vrcp.f32 %v58_v10 }
  0x3d   :  { %v72_v27 = vmul.f32 %v142_v9, %v71_v20  ;;  %149 = vrcp.f32 %v67_v11 }
  0x44   :  { %v144_v25 = vpop.eup %143 }
  0x45   :  { %v146_v28 = vpop.eup %145  ;;  %v60_v30 = vmul.f32 0.6931472, %v144_v25 }
  0x46   :  { %v69_v31 = vmul.f32 0.6931472, %v146_v28  ;;  %v148_v37 = vpop.eup %147 }
  0x47   :  { %v66_v32 = vsel %vm65_vm0, %v63_v24, %v60_v30  ;;  %v150_v38 = vpop.eup %149  ;;  %v82_v39 = vmul.f32 %v148_v37, %v58_v10 }
  0x48   :  { %v75_v33 = vsel %vm74_vm1, %v72_v27, %v69_v31  ;;  %v76_v34 = vadd.f32 %v66_v32, %v56_v26  ;;  %v83_v40 = vmul.f32 %v150_v38, %v67_v11 }
  0x49   :  { %v77_v35 = vadd.f32 %v75_v33, %v57_v29  ;;  %v84_v41 = vsub.f32 2.0, %v82_v39 }
  0x4a   :  { %v85_v42 = vsub.f32 2.0, %v83_v40 }
  0x4b   :  { %v94_v36 = vadd.f32 %v77_v35, %v76_v34  ;;  %v86_v43 = vmul.f32 %v148_v37, %v84_v41 }
  0x4c   :  { %v87_v44 = vmul.f32 %v150_v38, %v85_v42 }
  0x4d   :  { %95 = vadd.xlane.f32.xlu0 %v94_v36  ;;  %v90_v45 = vsub.f32 1.0, %v86_v43 }
  0x4e   :  { %v91_v46 = vsub.f32 1.0, %v87_v44 }
  0x4f   :  { %v92_v47 = vsel %vm88_vm2, %v86_v43, %v90_v45 }
  0x50   :  { %v93_v48 = vsel %vm89_vm3, %v87_v44, %v91_v46  ;;  %v105_v56 = vsub.f32 %v42_v14, %v92_v47 }
  0x51   :  { %v106_v57 = vsub.f32 %v43_v15, %v93_v48 }
  0x52   :  { %v107_v58 = vmul.f32 %v105_v56, %v105_v56 }
  0x53   :  { %v108_v59 = vmul.f32 %v106_v57, %v106_v57 }
  0xda   :  { %v96_v49 = vpop.xlane.xlu0 %95 }
  0xdb   :  { %v97_v50 = vrot.slane %v96_v49, 4 }
  0xdd   :  { %v98_v51 = vadd.f32 %v97_v50, %v96_v49 }
  0xdf   :  { %v99_v52 = vrot.slane %v98_v51, 2 }
  0xe1   :  { %v100_v53 = vadd.f32 %v99_v52, %v98_v51 }
  0xe3   :  { %v101_v54 = vrot.slane %v100_v53, 1 }
  0xe5   :  { %v102_v55 = vadd.f32 %v101_v54, %v100_v53 }
  0xe7   :  { %132 = vpush %v102_v55 }
 0x118   :  { %s133_s1 = spop %132 }
 0x119   :  { %s104_s6 = smul.f32 0.00048828125, %s133_s1 }
 0x11b   :  { %v109_v60 = vstv %s104_s6 }
 0x11c   :  { %v110_v61 = vmul.f32 %v109_v60, %v107_v58  ;;  %v111_v62 = vmul.f32 %v109_v60, %v108_v59 }
 0x11e   :  { %112 = vst [vmem:[#allocation7] sm:$0xff] %v110_v61  ;;  %113 = vst [vmem:[#allocation7 + $0x8] sm:$0xff] %v111_v62 }
 0x11f   :  { %206 = shalt.err (!%p203_p6)
}
 0x120   :  { %s207_s12 = scalar_lea.hbm %s290_s2, 256 }
 0x121   :  { %p208_p7 = scmp.ne.s32.totalorder %s290_s2, %s207_s12  ;;  %p211_p8 = scmp.lt.u32.totalorder %s207_s12, %s290_s2 }
 0x123   :  { %p213_p9 = pnand %p211_p8, %p208_p7 }
 0x125   :  { %216 = shalt.err (!%p213_p9)
}
 0x126   :  { %125 = dma.vmem_to_hbm [thread:$0]  %s120_s8, 256, %s290_s2, [#allocation4], %s224_s19, %s224_s19, %s225_s20  }
 0x127   :  { %221 = dma.done.wait [#allocation4], 256  }
 0x128   :  { %222 = vsyncadd [#allocation4], 4294967040 }
 0x129   :  { %129 = vsyncpa [#allocation3], 1 }
 0x12a   :  { %130 = vsyncpa [#allocation6], 1 }
 0x12b   :  { %131 = vsyncpa [#allocation4], 1 }

</bundles_post_ra>
